<compile_context>
chip_gen: v5e
topology: v5e:2x2
jax: 0.10.0
libtpu: 0.0.40
codegen_flags: <defaults>
</compile_context>

<pallas_src>
import functools

import jax
import jax.numpy as jnp
from jax import lax
from jax.experimental import pallas as pl
from jax.experimental.pallas import tpu as pltpu


def _triplet_wrt_kernel(xr_ref, xf_ref, sqc_ref, tcol_ref, trow_ref,
                        out_ref, acc_ref, *, inv_n):
    i = pl.program_id(0)

    @pl.when(i == 0)
    def _():
        acc_ref[...] = jnp.zeros_like(acc_ref)

    xr = xr_ref[...]                       # (TM, D), native dtype (f32 / bf16)
    xf = xf_ref[...]                       # (N,  D), native dtype, resident

    # gram[r, c] = <x_r, x_c>; contraction expressed directly (no x.T materialized)
    gram = lax.dot_general(
        xr, xf,
        dimension_numbers=(((1,), (1,)), ((), ())),
        preferred_element_type=jnp.float32)                 # (TM, N) f32 on MXU

    xr32 = xr.astype(jnp.float32)
    sq_r = jnp.sum(xr32 * xr32, axis=1, keepdims=True)      # (TM, 1)
    sq_c = sqc_ref[...]                                     # (1, N) from wrapper

    dist2 = sq_r + sq_c - 2.0 * gram
    dist = jnp.sqrt(jnp.maximum(dist2, 1e-12))              # (TM, N)

    is_pos = (tcol_ref[...] == trow_ref[...]).astype(jnp.float32)   # (TM, N)
    is_neg = 1.0 - is_pos

    dist_ap = dist * is_pos
    dist_an = dist * is_neg

    # softmax_weights(dist_ap, is_pos); dist_ap is already masked -> max directly.
    max_ap = jnp.max(dist_ap, axis=1, keepdims=True)
    e_ap = jnp.exp(dist_ap - max_ap) * is_pos               # masked exp, reused
    z_ap = jnp.sum(e_ap, axis=1, keepdims=True) + 1e-6
    furthest_positive = (jnp.sum(dist_ap * e_ap, axis=1, keepdims=True)
                         * pl.reciprocal(z_ap, approx=True))        # (TM, 1)

    # softmax_weights(-dist_an, is_neg)
    neg_an = -dist_an
    max_an = jnp.max(neg_an, axis=1, keepdims=True)
    e_an = jnp.exp(neg_an - max_an) * is_neg
    z_an = jnp.sum(e_an, axis=1, keepdims=True) + 1e-6
    closest_negative = (jnp.sum(dist_an * e_an, axis=1, keepdims=True)
                        * pl.reciprocal(z_an, approx=True))         # (TM, 1)

    # SoftMarginLoss(margin, y=1) = mean(softplus(-margin)), stable form.
    margin = closest_negative - furthest_positive                   # (TM, 1)
    softplus = jnp.maximum(-margin, 0.0) + jnp.log1p(jnp.exp(-jnp.abs(margin)))

    acc_ref[...] += jnp.sum(softplus, axis=0, keepdims=True)        # (1, 1)

    @pl.when(i == pl.num_programs(0) - 1)
    def _():
        out_ref[...] = acc_ref[...] * inv_n


def _pick_block_rows(n):
    for cand in (256, 128, 64, 32, 16, 8):
        if n % cand == 0:
            return cand
    return n


def triplet_loss_wrt(inputs, targets, normalize_feature=False, block_rows=None):
    """inputs: (N, D) float32/bfloat16 features; targets: (N,) integer labels."""
    if inputs.dtype not in (jnp.bfloat16, jnp.float32):
        inputs = inputs.astype(jnp.float32)

    if normalize_feature:
        x32 = inputs.astype(jnp.float32)
        nrm = jnp.sqrt(jnp.sum(x32 * x32, axis=-1, keepdims=True))
        inputs = (x32 / (nrm + 1e-12)).astype(inputs.dtype)

    n, d = inputs.shape
    tm = block_rows if block_rows is not None else _pick_block_rows(n)
    assert n % tm == 0, "block_rows must divide N"
    grid = (n // tm,)

    # Wrapper-side layout plumbing (free at XLA level; avoids in-kernel transposes).
    x32 = inputs.astype(jnp.float32)
    sq_cols = jnp.sum(x32 * x32, axis=1).reshape(1, n)       # (1, N) f32, lane-major
    t_i32 = targets.astype(jnp.int32)
    t_col = t_i32.reshape(n, 1)
    t_row = t_i32.reshape(1, n)

    # VMEM budget: double-buffered row slab + resident full x + (TM, N) temporaries.
    bytes_per = jnp.dtype(inputs.dtype).itemsize
    est = (2 * tm * d * bytes_per       # double-buffered row slab of x
           + n * d * bytes_per          # resident full x
           + 10 * tm * n * 4            # f32 (TM, N) intermediates
           + 8 * n * 4)                 # small row/col vectors
    vmem_bytes = int(min(64 * 1024 * 1024, max(32 * 1024 * 1024, 2 * est)))

    kernel = functools.partial(_triplet_wrt_kernel, inv_n=1.0 / float(n))

    out = pl.pallas_call(
        kernel,
        out_shape=jax.ShapeDtypeStruct((1, 1), jnp.float32),
        grid_spec=pltpu.PrefetchScalarGridSpec(
            num_scalar_prefetch=0,
            grid=grid,
            in_specs=[
                pl.BlockSpec((tm, d), lambda i: (i, 0)),     # row slab of x
                pl.BlockSpec((n, d), lambda i: (0, 0)),      # full x (stays resident)
                pl.BlockSpec((1, n), lambda i: (0, 0)),      # column squared norms
                pl.BlockSpec((tm, 1), lambda i: (i, 0)),     # labels, column view
                pl.BlockSpec((1, n), lambda i: (0, 0)),      # labels, row view
            ],
            out_specs=pl.BlockSpec((1, 1), lambda i: (0, 0)),
            scratch_shapes=[pltpu.VMEM((1, 1), jnp.float32)],
        ),
        compiler_params=pltpu.CompilerParams(
            dimension_semantics=("arbitrary",),   # loss accumulates across the axis
            vmem_limit_bytes=vmem_bytes,
        ),
    )(inputs, inputs, sq_cols, t_col, t_row)
    return out[0, 0]


if __name__ == "__main__":
    key = jax.random.PRNGKey(0)
    N, D = 16, 32
    inputs = jax.random.normal(key, (N, D), dtype=jnp.float32)
    targets = jnp.array([0, 0, 1, 1, 2, 2, 3, 3, 4, 4, 5, 5, 6, 6, 7, 7],
                        dtype=jnp.int32)

    # block_rows=8 -> grid of 2; exercises the accumulate-across-grid path.
    loss = triplet_loss_wrt(inputs, targets, block_rows=8)
    jax.block_until_ready(loss)

    # Pure-JAX reference (same math as the PyTorch module).
    def ref_loss(x, t):
        sq = jnp.sum(x * x, axis=1, keepdims=True)
        dist = jnp.sqrt(jnp.maximum(sq + sq.T - 2.0 * x @ x.T, 1e-12))
        tp = t.reshape(-1, 1)
        is_pos = (tp == tp.T).astype(jnp.float32)
        is_neg = 1.0 - is_pos
        d_ap, d_an = dist * is_pos, dist * is_neg

        def sw(dm, m):
            mx = jnp.max(dm * m, axis=1, keepdims=True)
            e = jnp.exp(dm - mx)
            return e * m / (jnp.sum(e * m, axis=1, keepdims=True) + 1e-6)

        fp = jnp.sum(d_ap * sw(d_ap, is_pos), axis=1)
        cn = jnp.sum(d_an * sw(-d_an, is_neg), axis=1)
        margin = cn - fp
        return jnp.mean(jnp.maximum(-margin, 0.0)
                        + jnp.log1p(jnp.exp(-jnp.abs(margin))))

    ref = ref_loss(inputs, targets)
    # approx reciprocal on the EUP -> slightly looser tolerance than exact divide
    assert jnp.allclose(loss, ref, rtol=1e-2, atol=1e-2), (loss, ref)
    print("KERNEL_OK")
</pallas_src>

<mosaic_0001>
module attributes {stable_mosaic.version = 11 : i64} {
  func.func @_triplet_wrt_kernel(%arg0: i32, %arg1: memref<8x32xf32, #tpu.memory_space<vmem>>, %arg2: memref<16x32xf32, #tpu.memory_space<vmem>>, %arg3: memref<1x16xf32, #tpu.memory_space<vmem>>, %arg4: memref<8x1xi32, #tpu.memory_space<vmem>>, %arg5: memref<1x16xi32, #tpu.memory_space<vmem>>, %arg6: memref<1x1xf32, #tpu.memory_space<vmem>>, %arg7: memref<1x1xf32, #tpu.memory_space<vmem>>) attributes {dimension_semantics = [#tpu.dimension_semantics<arbitrary>], iteration_bounds = array<i64: 2>, scalar_prefetch = 0 : i64, scratch_operands = 1 : i64, tpu.core_type = #tpu.core_type<tc>, window_params = [{transform_indices = @transform_0, window_bounds = array<i64: 8, 32>}, {pipeline_mode = #tpu.pipeline_mode<synchronous>, transform_indices = @transform_1, window_bounds = array<i64: 16, 32>}, {pipeline_mode = #tpu.pipeline_mode<synchronous>, transform_indices = @transform_2, window_bounds = array<i64: 1, 16>}, {transform_indices = @transform_3, window_bounds = array<i64: 8, 1>}, {pipeline_mode = #tpu.pipeline_mode<synchronous>, transform_indices = @transform_4, window_bounds = array<i64: 1, 16>}, {pipeline_mode = #tpu.pipeline_mode<synchronous>, transform_indices = @transform_5, window_bounds = array<i64: 1, 1>}]} {
    %c0_i32 = arith.constant 0 : i32
    %0 = arith.cmpi eq, %arg0, %c0_i32 : i32
    %1 = arith.extui %0 : i1 to i32
    %c0_i32_0 = arith.constant 0 : i32
    %2 = arith.cmpi ne, %1, %c0_i32_0 : i32
    scf.if %2 {
      %cst_32 = arith.constant 0.000000e+00 : f32
      %81 = vector.broadcast %cst_32 : f32 to vector<1x1xf32>
      %c0_33 = arith.constant 0 : index
      %c0_34 = arith.constant 0 : index
      %82 = vector.load %arg7[%c0_33, %c0_34] : memref<1x1xf32, #tpu.memory_space<vmem>>, vector<1x1xf32>
      tpu.vector_store %arg7[%c0_33, %c0_34], %81 {strides = array<i32>} : memref<1x1xf32, #tpu.memory_space<vmem>>, vector<1x1xf32>,
    } else {
    }
    %c0 = arith.constant 0 : index
    %c0_1 = arith.constant 0 : index
    %3 = vector.load %arg1[%c0, %c0_1] : memref<8x32xf32, #tpu.memory_space<vmem>>, vector<8x32xf32>
    %c0_2 = arith.constant 0 : index
    %c0_3 = arith.constant 0 : index
    %4 = vector.load %arg2[%c0_2, %c0_3] : memref<16x32xf32, #tpu.memory_space<vmem>>, vector<16x32xf32>
    %cst = arith.constant dense<0.000000e+00> : vector<8x16xf32>
    %5 = tpu.matmul %3, %4, %cst {dimension_numbers = #tpu.dot_dimension_numbers<[1], [1], [0], [0], [0, 0, 1, 0], [], []>} : vector<8x32xf32>, vector<16x32xf32>, vector<8x16xf32> -> vector<8x16xf32>
    %6 = arith.mulf %3, %3 : vector<8x32xf32>
    %cst_4 = arith.constant dense<0.000000e+00> : vector<8xf32>
    %7 = vector.multi_reduction <add>, %6, %cst_4 [1] : vector<8x32xf32> to vector<8xf32>
    %8 = vector.shape_cast %7 : vector<8xf32> to vector<8x1xf32>
    %c0_5 = arith.constant 0 : index
    %c0_6 = arith.constant 0 : index
    %9 = vector.load %arg3[%c0_5, %c0_6] : memref<1x16xf32, #tpu.memory_space<vmem>>, vector<1x16xf32>
    %10 = vector.broadcast %8 : vector<8x1xf32> to vector<8x16xf32>
    %11 = vector.broadcast %9 : vector<1x16xf32> to vector<8x16xf32>
    %12 = arith.addf %10, %11 : vector<8x16xf32>
    %cst_7 = arith.constant 2.000000e+00 : f32
    %13 = vector.broadcast %cst_7 : f32 to vector<8x16xf32>
    %14 = arith.mulf %13, %5 : vector<8x16xf32>
    %15 = arith.subf %12, %14 : vector<8x16xf32>
    %cst_8 = arith.constant 9.99999996E-13 : f32
    %16 = vector.broadcast %cst_8 : f32 to vector<8x16xf32>
    %17 = arith.maximumf %15, %16 : vector<8x16xf32>
    %18 = math.sqrt %17 : vector<8x16xf32>
    %c0_9 = arith.constant 0 : index
    %c0_10 = arith.constant 0 : index
    %19 = vector.load %arg4[%c0_9, %c0_10] : memref<8x1xi32, #tpu.memory_space<vmem>>, vector<8x1xi32>
    %c0_11 = arith.constant 0 : index
    %c0_12 = arith.constant 0 : index
    %20 = vector.load %arg5[%c0_11, %c0_12] : memref<1x16xi32, #tpu.memory_space<vmem>>, vector<1x16xi32>
    %21 = vector.broadcast %19 : vector<8x1xi32> to vector<8x16xi32>
    %22 = vector.broadcast %20 : vector<1x16xi32> to vector<8x16xi32>
    %23 = arith.cmpi eq, %21, %22 : vector<8x16xi32>
    %24 = arith.extui %23 : vector<8x16xi1> to vector<8x16xi32>
    %25 = arith.sitofp %24 : vector<8x16xi32> to vector<8x16xf32>
    %cst_13 = arith.constant 1.000000e+00 : f32
    %26 = vector.broadcast %cst_13 : f32 to vector<8x16xf32>
    %27 = arith.subf %26, %25 : vector<8x16xf32>
    %28 = arith.mulf %18, %25 : vector<8x16xf32>
    %29 = arith.mulf %18, %27 : vector<8x16xf32>
    %cst_14 = arith.constant dense<0xFF800000> : vector<8xf32>
    %30 = vector.multi_reduction <maximumf>, %28, %cst_14 [1] : vector<8x16xf32> to vector<8xf32>
    %31 = vector.shape_cast %30 : vector<8xf32> to vector<8x1xf32>
    %32 = vector.broadcast %31 : vector<8x1xf32> to vector<8x16xf32>
    %33 = arith.subf %28, %32 : vector<8x16xf32>
    %34 = math.exp %33 : vector<8x16xf32>
    %35 = arith.mulf %34, %25 : vector<8x16xf32>
    %cst_15 = arith.constant dense<0.000000e+00> : vector<8xf32>
    %36 = vector.multi_reduction <add>, %35, %cst_15 [1] : vector<8x16xf32> to vector<8xf32>
    %37 = vector.shape_cast %36 : vector<8xf32> to vector<8x1xf32>
    %cst_16 = arith.constant 9.99999997E-7 : f32
    %38 = vector.broadcast %cst_16 : f32 to vector<8x1xf32>
    %39 = arith.addf %37, %38 : vector<8x1xf32>
    %40 = arith.mulf %28, %35 : vector<8x16xf32>
    %cst_17 = arith.constant dense<0.000000e+00> : vector<8xf32>
    %41 = vector.multi_reduction <add>, %40, %cst_17 [1] : vector<8x16xf32> to vector<8xf32>
    %42 = vector.shape_cast %41 : vector<8xf32> to vector<8x1xf32>
    %43 = tpu.reciprocal %39 {approx = true} : vector<8x1xf32> -> vector<8x1xf32>
    %44 = arith.mulf %42, %43 : vector<8x1xf32>
    %cst_18 = arith.constant 0.000000e+00 : f32
    %45 = vector.broadcast %cst_18 : f32 to vector<8x16xf32>
    %46 = arith.subf %45, %29 : vector<8x16xf32>
    %cst_19 = arith.constant dense<0xFF800000> : vector<8xf32>
    %47 = vector.multi_reduction <maximumf>, %46, %cst_19 [1] : vector<8x16xf32> to vector<8xf32>
    %48 = vector.shape_cast %47 : vector<8xf32> to vector<8x1xf32>
    %49 = vector.broadcast %48 : vector<8x1xf32> to vector<8x16xf32>
    %50 = arith.subf %46, %49 : vector<8x16xf32>
    %51 = math.exp %50 : vector<8x16xf32>
    %52 = arith.mulf %51, %27 : vector<8x16xf32>
    %cst_20 = arith.constant dense<0.000000e+00> : vector<8xf32>
    %53 = vector.multi_reduction <add>, %52, %cst_20 [1] : vector<8x16xf32> to vector<8xf32>
    %54 = vector.shape_cast %53 : vector<8xf32> to vector<8x1xf32>
    %cst_21 = arith.constant 9.99999997E-7 : f32
    %55 = vector.broadcast %cst_21 : f32 to vector<8x1xf32>
    %56 = arith.addf %54, %55 : vector<8x1xf32>
    %57 = arith.mulf %29, %52 : vector<8x16xf32>
    %cst_22 = arith.constant dense<0.000000e+00> : vector<8xf32>
    %58 = vector.multi_reduction <add>, %57, %cst_22 [1] : vector<8x16xf32> to vector<8xf32>
    %59 = vector.shape_cast %58 : vector<8xf32> to vector<8x1xf32>
    %60 = tpu.reciprocal %56 {approx = true} : vector<8x1xf32> -> vector<8x1xf32>
    %61 = arith.mulf %59, %60 : vector<8x1xf32>
    %62 = arith.subf %61, %44 : vector<8x1xf32>
    %cst_23 = arith.constant 0.000000e+00 : f32
    %63 = vector.broadcast %cst_23 : f32 to vector<8x1xf32>
    %64 = arith.subf %63, %62 : vector<8x1xf32>
    %cst_24 = arith.constant 0.000000e+00 : f32
    %65 = vector.broadcast %cst_24 : f32 to vector<8x1xf32>
    %66 = arith.maximumf %64, %65 : vector<8x1xf32>
    %67 = math.absf %62 : vector<8x1xf32>
    %cst_25 = arith.constant 0.000000e+00 : f32
    %68 = vector.broadcast %cst_25 : f32 to vector<8x1xf32>
    %69 = arith.subf %68, %67 : vector<8x1xf32>
    %70 = math.exp %69 : vector<8x1xf32>
    %71 = math.log1p %70 : vector<8x1xf32>
    %72 = arith.addf %66, %71 : vector<8x1xf32>
    %c0_26 = arith.constant 0 : index
    %c0_27 = arith.constant 0 : index
    %73 = vector.load %arg7[%c0_26, %c0_27] : memref<1x1xf32, #tpu.memory_space<vmem>>, vector<1x1xf32>
    %cst_28 = arith.constant dense<0.000000e+00> : vector<1xf32>
    %74 = vector.multi_reduction <add>, %72, %cst_28 [0] : vector<8x1xf32> to vector<1xf32>
    %75 = vector.shape_cast %74 : vector<1xf32> to vector<1x1xf32>
    %76 = arith.addf %73, %75 : vector<1x1xf32>
    %c0_29 = arith.constant 0 : index
    %c0_30 = arith.constant 0 : index
    %77 = vector.load %arg7[%c0_29, %c0_30] : memref<1x1xf32, #tpu.memory_space<vmem>>, vector<1x1xf32>
    tpu.vector_store %arg7[%c0_29, %c0_30], %76 {strides = array<i32>} : memref<1x1xf32, #tpu.memory_space<vmem>>, vector<1x1xf32>,
    %c1_i32 = arith.constant 1 : i32
    %78 = arith.cmpi eq, %arg0, %c1_i32 : i32
    %79 = arith.extui %78 : i1 to i32
    %c0_i32_31 = arith.constant 0 : i32
    %80 = arith.cmpi ne, %79, %c0_i32_31 : i32
    scf.if %80 {
      %c0_32 = arith.constant 0 : index
      %c0_33 = arith.constant 0 : index
      %81 = vector.load %arg7[%c0_32, %c0_33] : memref<1x1xf32, #tpu.memory_space<vmem>>, vector<1x1xf32>
      %cst_34 = arith.constant 6.250000e-02 : f32
      %82 = vector.broadcast %cst_34 : f32 to vector<1x1xf32>
      %83 = arith.mulf %81, %82 : vector<1x1xf32>
      %c0_35 = arith.constant 0 : index
      %c0_36 = arith.constant 0 : index
      %84 = vector.load %arg6[%c0_35, %c0_36] : memref<1x1xf32, #tpu.memory_space<vmem>>, vector<1x1xf32>
      tpu.vector_store %arg6[%c0_35, %c0_36], %83 {strides = array<i32>} : memref<1x1xf32, #tpu.memory_space<vmem>>, vector<1x1xf32>,
    } else {
    }
    return
  }
  func.func @transform_0(%arg0: i32) -> (i32, i32) {
    %c0_i32 = arith.constant 0 : i32
    %c0_i32_0 = arith.constant 0 : i32
    return %arg0, %c0_i32 : i32, i32
  }
  func.func @transform_1(%arg0: i32) -> (i32, i32) {
    %c0_i32 = arith.constant 0 : i32
    %c0_i32_0 = arith.constant 0 : i32
    %c0_i32_1 = arith.constant 0 : i32
    return %c0_i32, %c0_i32_0 : i32, i32
  }
  func.func @transform_2(%arg0: i32) -> (i32, i32) {
    %c0_i32 = arith.constant 0 : i32
    %c0_i32_0 = arith.constant 0 : i32
    %c0_i32_1 = arith.constant 0 : i32
    return %c0_i32, %c0_i32_0 : i32, i32
  }
  func.func @transform_3(%arg0: i32) -> (i32, i32) {
    %c0_i32 = arith.constant 0 : i32
    %c0_i32_0 = arith.constant 0 : i32
    return %arg0, %c0_i32 : i32, i32
  }
  func.func @transform_4(%arg0: i32) -> (i32, i32) {
    %c0_i32 = arith.constant 0 : i32
    %c0_i32_0 = arith.constant 0 : i32
    %c0_i32_1 = arith.constant 0 : i32
    return %c0_i32, %c0_i32_0 : i32, i32
  }
  func.func @transform_5(%arg0: i32) -> (i32, i32) {
    %c0_i32 = arith.constant 0 : i32
    %c0_i32_0 = arith.constant 0 : i32
    %c0_i32_1 = arith.constant 0 : i32
    return %c0_i32, %c0_i32_0 : i32, i32
  }
}

</mosaic_0001>

<bundles_post_ra>
// kernel: tpu_custom_call.1
= control target key start
LH: loop header
LB: loop body
LE: loop exit
PB: predicated region body
PF: predicated region fallthrough
CT: control target
= control target key end

     0   :  { %10 = vsyncpa [#allocation4], 0  ;;  %s681_s0 = inlined_call_operand.vmem [shape: f32[16,32], index: 0, kind: input, shape index: {}]   ;;  %s682_s1 = inlined_call_operand.hbm [shape: f32[16,32], index: 1, kind: input, shape index: {}]   ;;  %s683_s2 = inlined_call_operand.vmem [shape: f32[1,16], index: 2, kind: input, shape index: {}]   ;;  %s684_s3 = inlined_call_operand.vmem [shape: s32[16,1], index: 3, kind: input, shape index: {}]   ;;  %s685_s4 = inlined_call_operand.vmem [shape: s32[1,16], index: 4, kind: input, shape index: {}]   ;;  %s686_s5 = inlined_call_operand.hbm [shape: f32[1,1], index: 5, kind: output, shape index: {}]  }
   0x1   :  { %11 = vsyncpa [#allocation5], 0  ;;  %s636_s18 = smov 0  }
   0x2 LB: > { %s169_s21 = sshll.u32 %s682_s1, 4  ;;  %s645_s22 = sadd.s32 4294967295, %s597_s18   ;;  %s597_s18 = sphi %s636_s18, %s17_s18   ;;  %s170_s21 = int_to_ptr.hbm [resolvable:$true] %s169_s21 }
   0x3   : > { %p460_p0 = scmp.ge.s32.totalorder %s597_s18, 1  ;;  %p158_p1 = scmp.lt.s32.totalorder %s597_s18, 3 }
   0x4   : > { %p461_p2 = scmp.ne.s32.totalorder %s645_s22, 0  ;;  %p489_p3 = scmp.eq.s32.totalorder %s645_s22, 0 }
   0x5   : > { %p159_p4 = pnand %p460_p0, %p158_p1  ;;  %s599_s23 = smov [#allocation3]  }
   0x6   : > { %s171_s24 = sshll.u32 %s599_s23, 4  ;;  %s600_s25 = smov 128   ;;  %s172_s24 = int_to_ptr.vmem [resolvable:$true] %s171_s24 }
   0x7   : > { %p485_p5 = pneg %p159_p4  ;;  %s601_s26 = smov 8  }
   0x8   : > { %207 = sbr.rel (%p159_p4) target bundleno = 510 (0x1fe), region = 40 }
   0x9   : > { %p486_p6 = pnand %p489_p3, %p485_p5 }
   0xb   : > { %488 = dma.hbm_to_vmem [thread:$0]  (!%p486_p6), %s170_s21, 256, %s172_s24, [#allocation4], %s600_s25, %s600_s25, %s601_s26  }
   0xd   : > { %588 = dma.done.wait (%p489_p3), [#allocation4], 256  }
   0xe   : > { %590 = vsyncadd (%p489_p3), [#allocation4], 4294967040  ;;  %p234_p7 = scmp.lt.s32.totalorder %s645_s22, 1 }
   0xf   : > { %245 = sbr.rel (%p461_p2) target bundleno = 22 (0x16), region = 48 }
  0x10   : > { %s235_s27 = scalar_select %p234_p7, %s645_s22, 1 }
  0x12   : > { %s465_s28 = sshll.u32 %s235_s27, 3 }
  0x13   : > { %s237_s6 = scalar_lea.vmem %s681_s0, %s465_s28  ;;  %s241_s9 = scalar_lea.vmem %s684_s3, %s465_s28 }
  0x14   : > { %vm246_vm0 = vcmask 0   ;;  %v602_v0 = vmov 0.0  }
  0x15   : > { %247 = vst.msk [vmem:[#allocation2] sm:$0x1] %vm246_vm0, %v602_v0 }
  0x16 PF: > { %v250_v1 = vld [vmem:[#allocation3 + $0x8] sm:$0xff]  ;;  %vm251_vm1 = vcmask 261120   ;;  %v248_v2 = vld [vmem:[%s237_s6] sm:$0xff]  ;;  %v603_v4 = vmov 0   ;;  %v604_v23 = vmov 0.0   ;;  %vm317_vm5 = vcmask 130048  }
  0x17   : > { %468 = vmatpush.xpose.msk.msra.mxu0 %vm251_vm1, %v250_v1  ;;  %v281_v3 = vmul.f32 %v248_v2, %v248_v2  ;;  %508 = vset.pattern.permute.xlu0 %v603_v4  ;;  %v249_v5 = vld [vmem:[#allocation3] sm:$0xff]  ;;  %v509_v8 = vld [vmem:[%s683_s2] ss:$0 sm:$0xff]  ;;  %vm378_vm7 = vcmask 0   ;;  %p472_p8 = scmp.ne.s32.totalorder %s645_s22, 1 }
  0x18   : > { %v305_v7 = vld [vmem:[%s241_s9] sm:$0xff] }
  0x19   : > { %v282_v6 = vsel %vm251_vm1, %v281_v3, 0.0  ;;  %v510_v17 = vld [vmem:[%s685_s4] ss:$0 sm:$0xff] }
  0x1a   : > { %283 = vadd.xlane.f32.xlu0 %v282_v6 }
  0x1b   : > { %469 = vmatpush.xpose.msk.msra.mxu0 %vm251_vm1, %v249_v5 }
  0x1e   : > { %470 = vmatmul.msk.f32.vlgmr.msra.gmra.mxu0 %vm251_vm1, %v248_v2 }
  0x2e   : > { %308 = vperm.xlu0 %508, %v305_v7  }
  0x8d   : > { %v284_v9 = vpop.xlane.xlu0 %283 }
  0x8e   : > { %v289_v10 = vadd.f32 %v509_v8, %v284_v9 }
  0x9b   : > { %v278_v11 = vpop.f32.mrf.mxu0 }
  0x9c   : > { %v290_v12 = vmul.f32 2.0, %v278_v11 }
  0x9e   : > { %v291_v13 = vsub.f32 %v289_v10, %v290_v12 }
  0xa0   : > { %v292_v14 = vmax.f32 %v291_v13, 1e-12  ;;  %v309_v19 = vpop.permute.xlu0 %308 }
  0xa1   : > { %vm311_vm2 = vcmp.eq.s32.totalorder %v309_v19, %v510_v17 }
  0xa2   : > { %511 = vrsqrt.f32 %v292_v14  ;;  %v471_v24 = vsel %vm311_vm2, 1.0, %v604_v23  ;;  %vm300_vm3 = vcmp.eq.f32.partialorder %v292_v14, inf  ;;  %v303_v26 = vand.u32 2147483648, %v292_v14 }
  0xa3   : > { %vm302_vm4 = vcmp.eq.f32.partialorder %v292_v14, 0.0  ;;  %v314_v28 = vsub.f32 1.0, %v471_v24 }
  0xa8   : > { %v512_v15 = vpop.eup %511 }
  0xa9   : > { %v294_v16 = vmul.f32 %v512_v15, %v292_v14 }
  0xab   : > { %v295_v18 = vmul.f32 %v512_v15, %v294_v16 }
  0xad   : > { %v296_v20 = vmul.f32 0.5, %v295_v18  ;;  %v370_v18 = vld [vmem:[#allocation2] sm:$0x1] }
  0xaf   : > { %v297_v21 = vsub.f32 1.5, %v296_v20 }
  0xb1   : > { %v298_v22 = vmul.f32 %v512_v15, %v297_v21 }
  0xb3   : > { %v299_v25 = vmul.f32 %v298_v22, %v292_v14 }
  0xb5   : > { %v301_v27 = vsel %vm300_vm3, %v292_v14, %v299_v25 }
  0xb6   : > { %v304_v29 = vsel %vm302_vm4, %v303_v26, %v301_v27 }
  0xb7   : > { %v315_v30 = vmul.f32 %v471_v24, %v304_v29  ;;  %v316_v32 = vmul.f32 %v314_v28, %v304_v29 }
  0xb9   : > { %v318_v31 = vsel %vm317_vm5, %v315_v30, -inf  ;;  %v335_v33 = vsub.f32 0.0, %v316_v32 }
  0xba   : > { %319 = vmax.xlane.f32.xlu1 %v318_v31 }
  0xbb   : > { %v336_v34 = vsel %vm317_vm5, %v335_v33, -inf }
  0xc2   : > { %337 = vmax.xlane.f32.xlu1 %v336_v34 }
 0x12d   : > { %v320_v35 = vpop.xlane.xlu1 %319 }
 0x12e   : > { %v321_v36 = vsub.f32 %v315_v30, %v320_v35 }
 0x130   : > { %v322_v37 = vmul.f32 1.442695, %v321_v36 }
 0x132   : > { %513 = vpow2.f32 %v322_v37 }
 0x135   : > { %v338_v38 = vpop.xlane.xlu1 %337 }
 0x136   : > { %v339_v39 = vsub.f32 %v335_v33, %v338_v38 }
 0x138   : > { %v514_v40 = vpop.eup %513  ;;  %v340_v41 = vmul.f32 1.442695, %v339_v39 }
 0x139   : > { %v324_v42 = vmul.f32 %v514_v40, %v471_v24 }
 0x13a   : > { %515 = vpow2.f32 %v340_v41 }
 0x13b   : > { %v325_v43 = vsel %vm317_vm5, %v324_v42, 0.0  ;;  %v329_v44 = vmul.f32 %v324_v42, %v315_v30 }
 0x13c   : > { %326 = vadd.xlane.f32.xlu2 %v325_v43 }
 0x13d   : > { %v330_v45 = vsel %vm317_vm5, %v329_v44, 0.0 }
 0x13e   : > { %331 = vadd.xlane.f32.xlu1 %v330_v45 }
 0x140   : > { %v516_v46 = vpop.eup %515 }
 0x141   : > { %v342_v47 = vmul.f32 %v516_v46, %v314_v28 }
 0x143   : > { %v343_v48 = vsel %vm317_vm5, %v342_v47, 0.0  ;;  %v347_v49 = vmul.f32 %v342_v47, %v316_v32 }
 0x144   : > { %344 = vadd.xlane.f32.xlu2 %v343_v48 }
 0x145   : > { %v348_v50 = vsel %vm317_vm5, %v347_v49, 0.0 }
 0x14c   : > { %349 = vadd.xlane.f32.xlu2 %v348_v50 }
 0x1af   : > { %v327_v51 = vpop.xlane.xlu2 %326 }
 0x1b0   : > { %v328_v52 = vadd.f32 1e-06, %v327_v51 }
 0x1b1   : > { %v332_v58 = vpop.xlane.xlu1 %331 }
 0x1b2   : > { %517 = vrcp.f32 %v328_v52 }
 0x1b7   : > { %v345_v53 = vpop.xlane.xlu2 %344 }
 0x1b8   : > { %v346_v54 = vadd.f32 1e-06, %v345_v53  ;;  %v518_v55 = vpop.eup %517 }
 0x1b9   : > { %v334_v59 = vmul.f32 %v518_v55, %v332_v58 }
 0x1ba   : > { %519 = vrcp.f32 %v346_v54 }
 0x1bf   : > { %v350_v56 = vpop.xlane.xlu2 %349 }
 0x1c0   : > { %v520_v57 = vpop.eup %519 }
 0x1c1   : > { %v352_v60 = vmul.f32 %v520_v57, %v350_v56 }
 0x1c3   : > { %v353_v61 = vsub.f32 %v352_v60, %v334_v59 }
 0x1c5   : > { %v356_v62 = vand.u32 2147483647, %v353_v61  ;;  %v354_v5 = vsub.f32 0.0, %v353_v61 }
 0x1c7   : > { %v357_v63 = vsub.f32 0.0, %v356_v62  ;;  %v355_v10 = vmax.f32 %v354_v5, 0.0 }
 0x1c9   : > { %v358_v0 = vmul.f32 1.442695, %v357_v63 }
 0x1cb   : > { %521 = vpow2.f32 %v358_v0 }
 0x1d1   : > { %v522_v1 = vpop.eup %521 }
 0x1d2   : > { %v360_v2 = vadd.f32 1.0, %v522_v1  ;;  %v363_v3 = vmul.f32 -0.5, %v522_v1  ;;  %v366_v6 = vand.u32 2147483647, %v522_v1 }
 0x1d4   : > { %523 = vlog2.f32 %v360_v2  ;;  %v364_v4 = vadd.f32 1.0, %v363_v3  ;;  %vm367_vm6 = vcmp.lt.f32.partialorder %v366_v6, 0.0004427343 }
 0x1d6   : > { %v365_v9 = vmul.f32 %v522_v1, %v364_v4 }
 0x1da   : > { %v524_v7 = vpop.eup %523 }
 0x1db   : > { %v362_v8 = vmul.f32 0.6931472, %v524_v7 }
 0x1dd   : > { %v368_v11 = vsel %vm367_vm6, %v365_v9, %v362_v8 }
 0x1de   : > { %v369_v12 = vadd.f32 %v368_v11, %v355_v10 }
 0x1e0   : > { %v371_v13 = vrot.slane %v369_v12, 4 }
 0x1e2   : > { %v372_v14 = vadd.f32 %v371_v13, %v369_v12 }
 0x1e4   : > { %v373_v15 = vrot.slane %v372_v14, 2 }
 0x1e6   : > { %v374_v16 = vadd.f32 %v373_v15, %v372_v14 }
 0x1e8   : > { %v375_v17 = vrot.slane %v374_v16, 1 }
 0x1ea   : > { %v376_v19 = vadd.f32 %v375_v17, %v374_v16  ;;  %383 = sbr.rel (%p472_p8) target bundleno = 505 (0x1f9), region = 52 }
 0x1ec   : > { %v377_v20 = vadd.f32 %v376_v19, %v370_v18 }
 0x1ee   : > { %379 = vst.msk [vmem:[#allocation2] sm:$0x1] %vm378_vm7, %v377_v20 }
 0x1f5   : > { %v384_v21 = vld [vmem:[#allocation2] sm:$0x1] }
 0x1f6   : > { %v385_v22 = vmul.f32 0.0625, %v384_v21 }
 0x1f8   : > { %386 = vst.msk [vmem:[#allocation6] sm:$0x1] %vm378_vm7, %v385_v22 }
 0x1f9 PF: > { %p491_p9 = scmp.eq.s32.totalorder %s645_s22, 1  ;;  %s605_s14 = smov [#allocation6]  }
 0x1fa   : > { %s393_s15 = sshll.u32 %s605_s14, 4  ;;  %s395_s19 = sshll.u32 %s686_s5, 4  ;;  %s394_s15 = int_to_ptr.vmem [resolvable:$true] %s393_s15  ;;  %s396_s19 = int_to_ptr.hbm [resolvable:$true] %s395_s19 }
 0x1fb   : > { %482 = dma.vmem_to_hbm [thread:$0]  (%p491_p9), %s394_s15, 16, %s396_s19, [#allocation5]  }
 0x1fc   : > { %592 = dma.done.wait (%p491_p9), [#allocation5], 16  }
 0x1fd   : > { %594 = vsyncadd (%p491_p9), [#allocation5], 4294967280 }
 0x1fe PF: > { %s17_s18 = sadd.s32 1, %s597_s18  }
 0x1ff   : > { %p14_p10 = scmp.ge.s32.totalorder %s17_s18, 4  }
 0x201   :  { %16 = sbr.rel (!%p14_p10) target bundleno = 2 (0x2), region = 83 }
 0x206   :  { %409 = vsyncpa [#allocation4], 1 }
 0x207   :  { %411 = vsyncpa [#allocation4 + $0x1], 1 }
 0x208   :  { %412 = vsyncpa [#allocation5], 1 }
 0x209   :  { %414 = vsyncpa [#allocation5 + $0x1], 1 }

</bundles_post_ra>
